<compile_context>
chip_gen: v6e
topology: v6e:2x2x1
jax: 0.10.0
libtpu: 0.0.40
codegen_flags: <defaults>
</compile_context>

<pallas_src>
import functools

import jax
import jax.numpy as jnp
from jax import lax
from jax.experimental import pallas as pl
from jax.experimental.pallas import tpu as pltpu


def _round_up(x, m):
    return ((x + m - 1) // m) * m


def _focal_loss_kernel(x_ref, t_ref, o_ref, *, alpha, gamma, n_valid, tile_n):
    """One grid step: (TN, C) logits + (TN, 1) targets -> one partial-sum block.

    The (1, 8, 128) output block is filled with the block's partial sum of the
    per-sample focal losses (padded rows contribute 0). The wrapper reduces the
    per-block partials and divides by N.
    """
    logits = x_ref[...].astype(jnp.float32)                 # (TN, C)
    tgt = t_ref[...]                                         # (TN, 1) int32

    # Numerically-stable log-sum-exp over the class (lane) axis.
    m = jnp.max(logits, axis=-1, keepdims=True)              # (TN, 1)
    lse = m + jnp.log(jnp.sum(jnp.exp(logits - m), axis=-1, keepdims=True))

    # Gather the target logit via a one-hot mask (no dynamic gather on TPU).
    class_ids = lax.broadcasted_iota(jnp.int32, logits.shape, 1)   # (TN, C)
    onehot = class_ids == tgt                                       # (TN, C)
    tgt_logit = jnp.sum(jnp.where(onehot, logits, 0.0), axis=-1, keepdims=True)

    # Cross-entropy; clamp tiny negative rounding error so 1 - pt >= 0.
    ce = jnp.maximum(lse - tgt_logit, 0.0)                    # (TN, 1)
    pt = jnp.exp(-ce)
    one_minus_pt = 1.0 - pt

    # alpha/gamma are compile-time constants (matches the module defaults).
    if float(gamma) == 2.0:
        mod = jnp.square(one_minus_pt)                        # VPU mul, no EUP
    elif float(gamma) == int(gamma):
        mod = lax.integer_pow(one_minus_pt, int(gamma))
    else:
        mod = jnp.power(jnp.maximum(one_minus_pt, 0.0), jnp.float32(gamma))

    focal = jnp.float32(alpha) * mod * ce                     # (TN, 1)

    # Mask out padded rows (global row index >= n_valid).
    row0 = pl.program_id(0) * tile_n
    row_ids = row0 + lax.broadcasted_iota(jnp.int32, focal.shape, 0)
    focal = jnp.where(row_ids < n_valid, focal, 0.0)

    bsum = jnp.sum(focal)                                     # one reduce / block
    o_ref[...] = jnp.broadcast_to(bsum, o_ref.shape).astype(jnp.float32)


def focal_loss(inputs, targets, *, alpha=1.0, gamma=2.0, tile_n=None):
    """inputs: (N, C) float logits; targets: (N,) int labels. Returns scalar."""
    n, c = inputs.shape
    targets2d = targets.astype(jnp.int32).reshape(n, 1)

    if tile_n is None:
        # Target ~4 MiB of f32 logits per tile: with double-buffering of both
        # inputs this stays well under the scoped-VMEM defaults on every
        # generation (v5e 16 MiB, v6e 32 MiB, v7x 32 of 64 MiB physical).
        budget_rows = max(8, (4 * 1024 * 1024) // (max(c, 1) * 4))
        budget_rows = (budget_rows // 8) * 8
        tile_n = min(_round_up(n, 8), max(budget_rows, 8), 2048)
    tile_n = max(8, (tile_n // 8) * 8)

    n_pad = _round_up(n, tile_n)
    if n_pad != n:
        pad = n_pad - n
        inputs = jnp.pad(inputs, ((0, pad), (0, 0)))
        targets2d = jnp.pad(targets2d, ((0, pad), (0, 0)))  # class 0; masked in-kernel

    grid = n_pad // tile_n

    kernel = functools.partial(
        _focal_loss_kernel,
        alpha=float(alpha),
        gamma=float(gamma),
        n_valid=n,
        tile_n=tile_n,
    )

    partials = pl.pallas_call(
        kernel,
        out_shape=jax.ShapeDtypeStruct((grid, 8, 128), jnp.float32),
        grid_spec=pltpu.PrefetchScalarGridSpec(
            num_scalar_prefetch=0,
            grid=(grid,),
            in_specs=[
                pl.BlockSpec((tile_n, c), lambda i: (i, 0)),
                pl.BlockSpec((tile_n, 1), lambda i: (i, 0)),
            ],
            out_specs=pl.BlockSpec((1, 8, 128), lambda i: (i, 0, 0)),
        ),
        compiler_params=pltpu.CompilerParams(
            dimension_semantics=("parallel",),
            vmem_limit_bytes=32 * 1024 * 1024,
        ),
    )(inputs, targets2d)

    # Each block wrote its partial sum broadcast over an (8, 128) slab; pick
    # one element per block, sum, and take the mean over the real N.
    return jnp.sum(partials[:, 0, 0]) / jnp.float32(n)


def focal_loss_ref(inputs, targets, alpha=1.0, gamma=2.0):
    """Pure-JAX reference mirroring torch F.cross_entropy + focal weighting."""
    logp = jax.nn.log_softmax(inputs.astype(jnp.float32), axis=-1)
    ce = -jnp.take_along_axis(logp, targets[:, None].astype(jnp.int32), axis=-1)[:, 0]
    pt = jnp.exp(-ce)
    return jnp.mean(alpha * (1.0 - pt) ** gamma * ce)


if __name__ == "__main__":
    key = jax.random.PRNGKey(0)
    k1, k2 = jax.random.split(key)

    N, C = 16, 32  # small synthetic shapes: 16 samples, 32 classes
    inputs = jax.random.normal(k1, (N, C), dtype=jnp.float32)
    targets = jax.random.randint(k2, (N,), 0, C, dtype=jnp.int32)

    out = focal_loss(inputs, targets, alpha=1.0, gamma=2.0)
    out = jax.block_until_ready(out)

    ref = focal_loss_ref(inputs, targets, alpha=1.0, gamma=2.0)
    assert jnp.allclose(out, ref, rtol=1e-5, atol=1e-6), (out, ref)

    print("KERNEL_OK")
</pallas_src>

<mosaic_0001>
module attributes {stable_mosaic.version = 11 : i64} {
  func.func @_focal_loss_kernel(%arg0: i32, %arg1: memref<16x32xf32, #tpu.memory_space<vmem>>, %arg2: memref<16x1xi32, #tpu.memory_space<vmem>>, %arg3: memref<1x8x128xf32, #tpu.memory_space<vmem>>) attributes {dimension_semantics = [#tpu.dimension_semantics<parallel>], iteration_bounds = array<i64: 1>, scalar_prefetch = 0 : i64, scratch_operands = 0 : i64, tpu.core_type = #tpu.core_type<tc>, window_params = [{transform_indices = @transform_0, window_bounds = array<i64: 16, 32>}, {transform_indices = @transform_1, window_bounds = array<i64: 16, 1>}, {transform_indices = @transform_2, window_bounds = array<i64: 1, 8, 128>}]} {
    %c0 = arith.constant 0 : index
    %c0_0 = arith.constant 0 : index
    %0 = vector.load %arg1[%c0, %c0_0] : memref<16x32xf32, #tpu.memory_space<vmem>>, vector<16x32xf32>
    %c0_1 = arith.constant 0 : index
    %c0_2 = arith.constant 0 : index
    %1 = vector.load %arg2[%c0_1, %c0_2] : memref<16x1xi32, #tpu.memory_space<vmem>>, vector<16x1xi32>
    %cst = arith.constant dense<0xFF800000> : vector<16xf32>
    %2 = vector.multi_reduction <maximumf>, %0, %cst [1] : vector<16x32xf32> to vector<16xf32>
    %3 = vector.shape_cast %2 : vector<16xf32> to vector<16x1xf32>
    %4 = vector.broadcast %3 : vector<16x1xf32> to vector<16x32xf32>
    %5 = arith.subf %0, %4 : vector<16x32xf32>
    %6 = math.exp %5 : vector<16x32xf32>
    %cst_3 = arith.constant dense<0.000000e+00> : vector<16xf32>
    %7 = vector.multi_reduction <add>, %6, %cst_3 [1] : vector<16x32xf32> to vector<16xf32>
    %8 = vector.shape_cast %7 : vector<16xf32> to vector<16x1xf32>
    %9 = math.log %8 : vector<16x1xf32>
    %10 = arith.addf %3, %9 : vector<16x1xf32>
    %11 = tpu.iota {dimensions = array<i32: 1>} : vector<16x32xi32>
    %12 = vector.broadcast %1 : vector<16x1xi32> to vector<16x32xi32>
    %13 = arith.cmpi eq, %11, %12 : vector<16x32xi32>
    %cst_4 = arith.constant 0.000000e+00 : f32
    %14 = vector.broadcast %cst_4 : f32 to vector<16x32xf32>
    %15 = arith.select %13, %0, %14 : vector<16x32xi1>, vector<16x32xf32>
    %cst_5 = arith.constant dense<0.000000e+00> : vector<16xf32>
    %16 = vector.multi_reduction <add>, %15, %cst_5 [1] : vector<16x32xf32> to vector<16xf32>
    %17 = vector.shape_cast %16 : vector<16xf32> to vector<16x1xf32>
    %18 = arith.subf %10, %17 : vector<16x1xf32>
    %cst_6 = arith.constant 0.000000e+00 : f32
    %19 = vector.broadcast %cst_6 : f32 to vector<16x1xf32>
    %20 = arith.maximumf %18, %19 : vector<16x1xf32>
    %cst_7 = arith.constant 0.000000e+00 : f32
    %21 = vector.broadcast %cst_7 : f32 to vector<16x1xf32>
    %22 = arith.subf %21, %20 : vector<16x1xf32>
    %23 = math.exp %22 : vector<16x1xf32>
    %cst_8 = arith.constant 1.000000e+00 : f32
    %24 = vector.broadcast %cst_8 : f32 to vector<16x1xf32>
    %25 = arith.subf %24, %23 : vector<16x1xf32>
    %26 = arith.mulf %25, %25 : vector<16x1xf32>
    %cst_9 = arith.constant 1.000000e+00 : f32
    %27 = vector.broadcast %cst_9 : f32 to vector<16x1xf32>
    %28 = arith.mulf %27, %26 : vector<16x1xf32>
    %29 = arith.mulf %28, %20 : vector<16x1xf32>
    %c16_i32 = arith.constant 16 : i32
    %30 = arith.muli %arg0, %c16_i32 : i32
    %31 = tpu.iota {dimensions = array<i32: 0>} : vector<16x1xi32>
    %32 = vector.broadcast %30 : i32 to vector<16x1xi32>
    %33 = arith.addi %32, %31 : vector<16x1xi32>
    %c16_i32_10 = arith.constant 16 : i32
    %34 = vector.broadcast %c16_i32_10 : i32 to vector<16x1xi32>
    %35 = arith.cmpi slt, %33, %34 : vector<16x1xi32>
    %cst_11 = arith.constant 0.000000e+00 : f32
    %36 = vector.broadcast %cst_11 : f32 to vector<16x1xf32>
    %37 = arith.select %35, %29, %36 : vector<16x1xi1>, vector<16x1xf32>
    %38 = vector.shape_cast %37 : vector<16x1xf32> to vector<1x16x1xf32>
    %cst_12 = arith.constant dense<0.000000e+00> : vector<1xf32>
    %39 = vector.multi_reduction <add>, %38, %cst_12 [1, 2] : vector<1x16x1xf32> to vector<1xf32>
    %40 = vector.shape_cast %39 : vector<1xf32> to vector<1x1x1xf32>
    %41 = vector.extract %40[0, 0, 0] : f32 from vector<1x1x1xf32>
    %42 = vector.broadcast %41 : f32 to vector<1x8x128xf32>
    %c0_13 = arith.constant 0 : index
    %c0_14 = arith.constant 0 : index
    %c0_15 = arith.constant 0 : index
    %43 = vector.load %arg3[%c0_13, %c0_14, %c0_15] : memref<1x8x128xf32, #tpu.memory_space<vmem>>, vector<1x8x128xf32>
    tpu.vector_store %arg3[%c0_13, %c0_14, %c0_15], %42 {strides = array<i32>} : memref<1x8x128xf32, #tpu.memory_space<vmem>>, vector<1x8x128xf32>,
    return
  }
  func.func @transform_0(%arg0: i32) -> (i32, i32) {
    %c0_i32 = arith.constant 0 : i32
    %c0_i32_0 = arith.constant 0 : i32
    return %arg0, %c0_i32 : i32, i32
  }
  func.func @transform_1(%arg0: i32) -> (i32, i32) {
    %c0_i32 = arith.constant 0 : i32
    %c0_i32_0 = arith.constant 0 : i32
    return %arg0, %c0_i32 : i32, i32
  }
  func.func @transform_2(%arg0: i32) -> (i32, i32, i32) {
    %c0_i32 = arith.constant 0 : i32
    %c0_i32_0 = arith.constant 0 : i32
    %c0_i32_1 = arith.constant 0 : i32
    return %arg0, %c0_i32, %c0_i32_0 : i32, i32, i32
  }
}

</mosaic_0001>

<bundles_post_ra>
// kernel: tpu_custom_call.1
= control target key start
LH: loop header
LB: loop body
LE: loop exit
PB: predicated region body
PF: predicated region fallthrough
CT: control target
= control target key end

     0   :  { %vm16_vm0 = vcmask 261120   ;;  %v155_v4 = vmov 0   ;;  %s193_s0 = inlined_call_operand.vmem [shape: f32[16,32], index: 0, kind: input, shape index: {}]   ;;  %s194_s1 = inlined_call_operand.vmem [shape: s32[16,1], index: 1, kind: input, shape index: {}]   ;;  %s195_s2 = inlined_call_operand.hbm [shape: f32[1,8,128], index: 2, kind: output, shape index: {}]  }
   0x1   :  { %v12_v0 = vld [vmem:[%s193_s0] sm:$0xff]  ;;  %v13_v1 = vld [vmem:[%s193_s0 + $0x8] sm:$0xff]  ;;  %119 = vset.pattern.permute.xlu1 %v155_v4  ;;  %120 = vset.pattern.permute.xlu0 %v155_v4 }
   0x2   :  { %v14_v2 = vld [vmem:[%s194_s1] sm:$0xff]  ;;  %v17_v3 = vsel %vm16_vm0, %v12_v0, -inf }
   0x3   :  { %7 = vsyncpa [#allocation3], 0  ;;  %18 = vmax.xlane.f32.xlu0 %v17_v3  ;;  %44 = vperm.xlu1 %119, %v14_v2   ;;  %v20_v5 = vsel %vm16_vm0, %v13_v1, -inf  ;;  %v15_v6 = vld [vmem:[%s194_s1 + $0x8] sm:$0xff]  ;;  %v41_v13 = vlaneseq  ;;  %vm86_vm3 = vcmask 7168   ;;  %s156_s0 = smov [#allocation2]  }
   0x4   :  { %s107_s1 = sshll.u32 %s156_s0, 4  ;;  %s108_s1 = int_to_ptr.vmem [resolvable:$true] %s107_s1 }
   0x5   :  { %v42_v15 = vand.u32 127, %v41_v13  ;;  %s133_s18 = scalar_lea.vmem %s108_s1, 128  ;;  %p138_p1 = scmp.lt.s32.totalorder %s108_s1, %s108_s1 }
   0x6   :  { %p134_p0 = scmp.ne.s32.totalorder %s108_s1, %s133_s18  ;;  %p139_p2 = scmp.lt.s32.totalorder %s133_s18, %s133_s18 }
   0x7   :  { %21 = vmax.xlane.f32.xlu0 %v20_v5  ;;  %47 = vperm.xlu1 %119, %v15_v6  }
   0x8   :  { %p140_p3 = por %p139_p2, %p138_p1 }
   0xa   :  { %p141_p4 = pnand %p140_p3, %p134_p0 }
  0x7e   :  { %v45_v14 = vpop.permute.xlu1 %44 }
  0x7f   :  { %vm49_vm1 = vcmp.eq.s32.totalorder %v42_v15, %v45_v14 }
  0x80   :  { %v51_v18 = vsel %vm49_vm1, %v12_v0, 0.0 }
  0x81   :  { %v53_v20 = vsel %vm16_vm0, %v51_v18, 0.0 }
  0x82   :  { %v48_v16 = vpop.permute.xlu1 %47 }
  0x83   :  { %vm50_vm2 = vcmp.eq.s32.totalorder %v42_v15, %v48_v16 }
  0x84   :  { %v52_v22 = vsel %vm50_vm2, %v13_v1, 0.0 }
  0x85   :  { %v56_v24 = vsel %vm16_vm0, %v52_v22, 0.0 }
  0x8c   :  { %v19_v7 = vpop.xlane.xlu0 %18 }
  0x8d   :  { %v23_v8 = vsub.f32 %v12_v0, %v19_v7 }
  0x8f   :  { %v25_v9 = vmul.f32 1.442695, %v23_v8 }
  0x90   :  { %v22_v10 = vpop.xlane.xlu0 %21 }
  0x91   :  { %121 = vpow2.f32 %v25_v9  ;;  %v24_v11 = vsub.f32 %v13_v1, %v22_v10 }
  0x93   :  { %v27_v12 = vmul.f32 1.442695, %v24_v11 }
  0x95   :  { %123 = vpow2.f32 %v27_v12 }
  0x9e   :  { %v122_v17 = vpop.eup %121 }
  0x9f   :  { %v29_v19 = vsel %vm16_vm0, %v122_v17, 0.0 }
  0xa0   :  { %30 = vadd.xlane.f32.xlu0 %v29_v19 }
  0xa2   :  { %v124_v21 = vpop.eup %123 }
  0xa3   :  { %v32_v23 = vsel %vm16_vm0, %v124_v21, 0.0 }
  0xa4   :  { %33 = vadd.xlane.f32.xlu1 %v32_v23  ;;  %54 = vadd.xlane.f32.xlu0 %v53_v20 }
  0xa8   :  { %57 = vadd.xlane.f32.xlu0 %v56_v24 }
 0x129   :  { %v31_v25 = vpop.xlane.xlu0 %30 }
 0x12a   :  { %125 = vlog2.f32 %v31_v25 }
 0x12d   :  { %v34_v26 = vpop.xlane.xlu1 %33  ;;  %v55_v29 = vpop.xlane.xlu0 %54 }
 0x12e   :  { %127 = vlog2.f32 %v34_v26 }
 0x131   :  { %v58_v36 = vpop.xlane.xlu0 %57 }
 0x137   :  { %v126_v27 = vpop.eup %125 }
 0x138   :  { %v36_v28 = vmul.f32 0.6931472, %v126_v27 }
 0x13a   :  { %v39_v30 = vadd.f32 %v36_v28, %v19_v7 }
 0x13b   :  { %v128_v31 = vpop.eup %127 }
 0x13c   :  { %v38_v32 = vmul.f32 0.6931472, %v128_v31  ;;  %v59_v33 = vsub.f32 %v39_v30, %v55_v29 }
 0x13e   :  { %v61_v34 = vmax.f32 %v59_v33, 0.0  ;;  %v40_v35 = vadd.f32 %v38_v32, %v22_v10 }
 0x140   :  { %v63_v37 = vsub.f32 0.0, %v61_v34  ;;  %v60_v38 = vsub.f32 %v40_v35, %v58_v36 }
 0x142   :  { %v65_v39 = vmul.f32 1.442695, %v63_v37  ;;  %v62_v40 = vmax.f32 %v60_v38, 0.0 }
 0x144   :  { %129 = vpow2.f32 %v65_v39  ;;  %v64_v41 = vsub.f32 0.0, %v62_v40 }
 0x146   :  { %v67_v42 = vmul.f32 1.442695, %v64_v41 }
 0x148   :  { %131 = vpow2.f32 %v67_v42 }
 0x151   :  { %v130_v43 = vpop.eup %129 }
 0x152   :  { %v69_v44 = vsub.f32 1.0, %v130_v43 }
 0x154   :  { %v71_v45 = vmul.f32 %v69_v44, %v69_v44 }
 0x155   :  { %v132_v46 = vpop.eup %131 }
 0x156   :  { %v70_v47 = vsub.f32 1.0, %v132_v46  ;;  %v73_v48 = vmul.f32 %v71_v45, %v61_v34 }
 0x158   :  { %v72_v49 = vmul.f32 %v70_v47, %v70_v47  ;;  %v87_v51 = vsel %vm86_vm3, %v73_v48, 0.0 }
 0x15a   :  { %v74_v50 = vmul.f32 %v72_v49, %v62_v40 }
 0x15c   :  { %v88_v52 = vsel %vm86_vm3, %v74_v50, 0.0 }
 0x15d   :  { %v89_v53 = vadd.f32 %v88_v52, %v87_v51 }
 0x15f   :  { %90 = vadd.xlane.f32.xlu0 %v89_v53 }
 0x1e8   :  { %v91_v54 = vpop.xlane.xlu0 %90 }
 0x1e9   :  { %v92_v55 = vrot.slane %v91_v54, 4 }
 0x1eb   :  { %v93_v56 = vadd.f32 %v92_v55, %v91_v54 }
 0x1ed   :  { %v94_v57 = vrot.slane %v93_v56, 2 }
 0x1ef   :  { %v95_v58 = vadd.f32 %v94_v57, %v93_v56 }
 0x1f1   :  { %v96_v59 = vrot.slane %v95_v58, 1 }
 0x1f3   :  { %v97_v60 = vadd.f32 %v96_v59, %v95_v58 }
 0x1f5   :  { %115 = vpush %v97_v60 }
 0x226   :  { %s116_s17 = spop %115 }
 0x227   :  { %v99_v61 = vstv %s116_s17 }
 0x228   :  { %100 = vst [vmem:[#allocation2] sm:$0xff] %v99_v61 }
 0x229   :  { %144 = shalt.err (!%p141_p4)
}
 0x22a   :  { %110 = dma.vmem_to_hbm [thread:$0]  %s108_s1, 128, %s195_s2, [#allocation3]  }
 0x22b   :  { %153 = dma.done.wait [#allocation3], 128  }
 0x22c   :  { %154 = vsyncadd [#allocation3], 4294967168 }
 0x22d   :  { %114 = vsyncpa [#allocation3], 1 }

</bundles_post_ra>
